<compile_context>
chip_gen: v6e
topology: v6e:2x2x1
jax: 0.10.0
libtpu: 0.0.40
codegen_flags: <defaults>
</compile_context>

<pallas_src>
import functools

import jax
import jax.numpy as jnp
from jax.experimental import pallas as pl
from jax.experimental.pallas import tpu as pltpu


def _round_up(n, m):
    return ((n + m - 1) // m) * m


def _hsfail_kernel(x_ref, t1_ref, t2_ref, w1t_ref, b1_ref, w2t_ref, loss_ref,
                   *, batch, block_b, k):
    i = pl.program_id(0)

    x = x_ref[...]                         # (TB, D)  f32
    t1 = t1_ref[...]                       # (TB, 1)  i32
    t2 = t2_ref[...]                       # (TB, 1)  i32

    # ---- level 1: (TB, D) x (D, K) on the MXU -------------------------------
    l1 = jnp.dot(x, w1t_ref[...],
                 preferred_element_type=jnp.float32) + b1_ref[...]    # (TB, K)

    # ---- level 2: all group scores at once, (TB, D) x (D, K*K) --------------
    # column p = g*K + c of s_all holds  dot(level2_w[g, c, :], x[row])
    s_all = jnp.dot(x, w2t_ref[...],
                    preferred_element_type=jnp.float32)               # (TB, K*K)

    # ---- cross entropy, level 1 (vectorized over the whole tile) ------------
    col1 = jax.lax.broadcasted_iota(jnp.int32, l1.shape, 1)
    m1 = jnp.max(l1, axis=-1, keepdims=True)
    lse1 = m1 + jnp.log(jnp.sum(jnp.exp(l1 - m1), axis=-1, keepdims=True))
    pick1 = jnp.sum(jnp.where(col1 == t1, l1, 0.0), axis=-1, keepdims=True)
    ce1 = lse1 - pick1                                                # (TB, 1)

    # ---- cross entropy, level 2: restrict to group t2[i], pick class t2[i] --
    colp = jax.lax.broadcasted_iota(jnp.int32, s_all.shape, 1)        # (TB, K*K)
    lo = t2 * k                                                       # group start
    in_grp = jnp.logical_and(colp >= lo, colp < lo + k)
    masked = jnp.where(in_grp, s_all, jnp.float32(-1e30))
    m2 = jnp.max(masked, axis=-1, keepdims=True)
    e2 = jnp.where(in_grp, jnp.exp(s_all - m2), 0.0)
    lse2 = m2 + jnp.log(jnp.sum(e2, axis=-1, keepdims=True))
    pick2 = jnp.sum(jnp.where(colp == t2 * (k + 1), s_all, 0.0),
                    axis=-1, keepdims=True)                           # l2[i, t2[i]]
    ce2 = lse2 - pick2                                                # (TB, 1)

    # ---- mask padded rows, emit per-row losses (summed / B in the wrapper) --
    row = jax.lax.broadcasted_iota(jnp.int32, (block_b, 1), 0) + i * block_b
    valid = (row < batch).astype(jnp.float32)
    loss_ref[...] = (ce1 + ce2) * valid


def hsfail_loss(x, t, w1, b1, w2, branch_factor, *, block_b=256):
    """x: (B, D) f32, t: (B,) int targets in [0, K*K).  Returns scalar f32.

    block_b: batch rows per grid step (use ~128 on v5e, ~256 on v6e/v7x).
    """
    B, D = x.shape
    K = branch_factor

    t = t.astype(jnp.int32)
    t1 = (t // K).reshape(B, 1)
    t2 = (t % K).reshape(B, 1)

    # batch tile: multiple of 8 sublanes, capped by block_b and by the batch
    TB = min(_round_up(block_b, 8), _round_up(B, 8))
    B_pad = _round_up(B, TB)
    num_tiles = B_pad // TB

    pad = B_pad - B
    if pad:
        x = jnp.pad(x, ((0, pad), (0, 0)))
        t1 = jnp.pad(t1, ((0, pad), (0, 0)))
        t2 = jnp.pad(t2, ((0, pad), (0, 0)))

    # weights in matmul-friendly (in, out) layout; level-2 table flattened so
    # column p = g*K + c  <->  level2_w[g, c, :]
    w1t = w1.T                                        # (D, K)
    w2t = w2.reshape(K * K, D).T                      # (D, K*K)
    b1r = b1.reshape(1, K)

    kernel = functools.partial(_hsfail_kernel, batch=B, block_b=TB, k=K)

    per_row = pl.pallas_call(
        kernel,
        out_shape=jax.ShapeDtypeStruct((B_pad, 1), jnp.float32),
        grid_spec=pltpu.PrefetchScalarGridSpec(
            num_scalar_prefetch=0,
            grid=(num_tiles,),
            in_specs=[
                pl.BlockSpec((TB, D), lambda i: (i, 0)),        # x tile
                pl.BlockSpec((TB, 1), lambda i: (i, 0)),        # t1 tile
                pl.BlockSpec((TB, 1), lambda i: (i, 0)),        # t2 tile
                pl.BlockSpec((D, K), lambda i: (0, 0)),         # W1^T  (resident)
                pl.BlockSpec((1, K), lambda i: (0, 0)),         # b1    (resident)
                pl.BlockSpec((D, K * K), lambda i: (0, 0)),     # W2 flat (resident)
            ],
            out_specs=pl.BlockSpec((TB, 1), lambda i: (i, 0)),
        ),
        compiler_params=pltpu.CompilerParams(
            dimension_semantics=("parallel",)),
    )(x, t1, t2, w1t, b1r, w2t)

    # mean CE over both levels:  mean(ce1) + mean(ce2) == sum(ce1 + ce2) / B
    return jnp.sum(per_row) / jnp.float32(B)


def hsfail_loss_ref(x, t, w1, b1, w2, K):
    """Pure-JAX reference of the PyTorch forward."""
    t1 = t // K
    t2 = t % K
    l1 = x @ w1.T + b1
    l2 = jnp.einsum("bkd,bd->bk", w2[t2], x)

    def ce(logits, tgt):
        lse = jax.scipy.special.logsumexp(logits, axis=-1)
        picked = jnp.take_along_axis(logits, tgt[:, None], axis=1)[:, 0]
        return jnp.mean(lse - picked)

    return ce(l1, t1) + ce(l2, t2)


if __name__ == "__main__":
    B = 20           # batch (not a multiple of the tile -> exercises masking)
    D = 32           # input_size
    K = 4            # branch_factor
    VOCAB = K * K    # vocab_size = branch_factor**2 (two-level tree)

    key = jax.random.PRNGKey(0)
    kx, kt, kw1, kb1, kw2 = jax.random.split(key, 5)

    x = jax.random.normal(kx, (B, D), dtype=jnp.float32)
    t = jax.random.randint(kt, (B,), 0, VOCAB, dtype=jnp.int32)

    # nn.Linear(D, K): weight (K, D), bias (K,)  -- deterministic synthetic init
    bound = 1.0 / jnp.sqrt(D)
    w1 = jax.random.uniform(kw1, (K, D), jnp.float32, -bound, bound)
    b1 = jax.random.uniform(kb1, (K,), jnp.float32, -bound, bound)
    # level2_w (K, K, D), kaiming_normal-style init
    w2 = jax.random.normal(kw2, (K, K, D), dtype=jnp.float32) * jnp.sqrt(2.0 / D)

    loss_ref = jax.block_until_ready(hsfail_loss_ref(x, t, w1, b1, w2, K))

    # multi-tile + padded-tail path (TB=8 -> 3 tiles, last tile half padded)
    loss_a = jax.block_until_ready(hsfail_loss(x, t, w1, b1, w2, K, block_b=8))
    # default (single big tile) path
    loss_b = jax.block_until_ready(hsfail_loss(x, t, w1, b1, w2, K))

    assert jnp.allclose(loss_a, loss_ref, atol=1e-4, rtol=1e-4), (loss_a, loss_ref)
    assert jnp.allclose(loss_b, loss_ref, atol=1e-4, rtol=1e-4), (loss_b, loss_ref)
    print("KERNEL_OK")
</pallas_src>

<mosaic_0001>
module attributes {stable_mosaic.version = 11 : i64} {
  func.func @_hsfail_kernel(%arg0: i32, %arg1: memref<8x32xf32, #tpu.memory_space<vmem>>, %arg2: memref<8x1xi32, #tpu.memory_space<vmem>>, %arg3: memref<8x1xi32, #tpu.memory_space<vmem>>, %arg4: memref<32x4xf32, #tpu.memory_space<vmem>>, %arg5: memref<1x4xf32, #tpu.memory_space<vmem>>, %arg6: memref<32x16xf32, #tpu.memory_space<vmem>>, %arg7: memref<8x1xf32, #tpu.memory_space<vmem>>) attributes {dimension_semantics = [#tpu.dimension_semantics<parallel>], iteration_bounds = array<i64: 3>, scalar_prefetch = 0 : i64, scratch_operands = 0 : i64, tpu.core_type = #tpu.core_type<tc>, window_params = [{transform_indices = @transform_0, window_bounds = array<i64: 8, 32>}, {transform_indices = @transform_1, window_bounds = array<i64: 8, 1>}, {transform_indices = @transform_2, window_bounds = array<i64: 8, 1>}, {pipeline_mode = #tpu.pipeline_mode<synchronous>, transform_indices = @transform_3, window_bounds = array<i64: 32, 4>}, {pipeline_mode = #tpu.pipeline_mode<synchronous>, transform_indices = @transform_4, window_bounds = array<i64: 1, 4>}, {pipeline_mode = #tpu.pipeline_mode<synchronous>, transform_indices = @transform_5, window_bounds = array<i64: 32, 16>}, {transform_indices = @transform_6, window_bounds = array<i64: 8, 1>}]} {
    %c0 = arith.constant 0 : index
    %c0_0 = arith.constant 0 : index
    %0 = vector.load %arg1[%c0, %c0_0] : memref<8x32xf32, #tpu.memory_space<vmem>>, vector<8x32xf32>
    %c0_1 = arith.constant 0 : index
    %c0_2 = arith.constant 0 : index
    %1 = vector.load %arg2[%c0_1, %c0_2] : memref<8x1xi32, #tpu.memory_space<vmem>>, vector<8x1xi32>
    %c0_3 = arith.constant 0 : index
    %c0_4 = arith.constant 0 : index
    %2 = vector.load %arg3[%c0_3, %c0_4] : memref<8x1xi32, #tpu.memory_space<vmem>>, vector<8x1xi32>
    %c0_5 = arith.constant 0 : index
    %c0_6 = arith.constant 0 : index
    %3 = vector.load %arg4[%c0_5, %c0_6] : memref<32x4xf32, #tpu.memory_space<vmem>>, vector<32x4xf32>
    %cst = arith.constant dense<0.000000e+00> : vector<8x4xf32>
    %4 = tpu.matmul %0, %3, %cst {dimension_numbers = #tpu.dot_dimension_numbers<[1], [0], [0], [1], [0, 0, 1, 1], [], []>} : vector<8x32xf32>, vector<32x4xf32>, vector<8x4xf32> -> vector<8x4xf32>
    %c0_7 = arith.constant 0 : index
    %c0_8 = arith.constant 0 : index
    %5 = vector.load %arg5[%c0_7, %c0_8] : memref<1x4xf32, #tpu.memory_space<vmem>>, vector<1x4xf32>
    %6 = vector.broadcast %5 : vector<1x4xf32> to vector<8x4xf32>
    %7 = arith.addf %4, %6 : vector<8x4xf32>
    %c0_9 = arith.constant 0 : index
    %c0_10 = arith.constant 0 : index
    %8 = vector.load %arg6[%c0_9, %c0_10] : memref<32x16xf32, #tpu.memory_space<vmem>>, vector<32x16xf32>
    %cst_11 = arith.constant dense<0.000000e+00> : vector<8x16xf32>
    %9 = tpu.matmul %0, %8, %cst_11 {dimension_numbers = #tpu.dot_dimension_numbers<[1], [0], [0], [1], [0, 0, 1, 1], [], []>} : vector<8x32xf32>, vector<32x16xf32>, vector<8x16xf32> -> vector<8x16xf32>
    %10 = tpu.iota {dimensions = array<i32: 1>} : vector<8x4xi32>
    %cst_12 = arith.constant dense<0xFF800000> : vector<8xf32>
    %11 = vector.multi_reduction <maximumf>, %7, %cst_12 [1] : vector<8x4xf32> to vector<8xf32>
    %12 = vector.shape_cast %11 : vector<8xf32> to vector<8x1xf32>
    %13 = vector.broadcast %12 : vector<8x1xf32> to vector<8x4xf32>
    %14 = arith.subf %7, %13 : vector<8x4xf32>
    %15 = math.exp %14 : vector<8x4xf32>
    %cst_13 = arith.constant dense<0.000000e+00> : vector<8xf32>
    %16 = vector.multi_reduction <add>, %15, %cst_13 [1] : vector<8x4xf32> to vector<8xf32>
    %17 = vector.shape_cast %16 : vector<8xf32> to vector<8x1xf32>
    %18 = math.log %17 : vector<8x1xf32>
    %19 = arith.addf %12, %18 : vector<8x1xf32>
    %20 = vector.broadcast %1 : vector<8x1xi32> to vector<8x4xi32>
    %21 = arith.cmpi eq, %10, %20 : vector<8x4xi32>
    %cst_14 = arith.constant 0.000000e+00 : f32
    %22 = vector.broadcast %cst_14 : f32 to vector<8x4xf32>
    %23 = arith.select %21, %7, %22 : vector<8x4xi1>, vector<8x4xf32>
    %cst_15 = arith.constant dense<0.000000e+00> : vector<8xf32>
    %24 = vector.multi_reduction <add>, %23, %cst_15 [1] : vector<8x4xf32> to vector<8xf32>
    %25 = vector.shape_cast %24 : vector<8xf32> to vector<8x1xf32>
    %26 = arith.subf %19, %25 : vector<8x1xf32>
    %27 = tpu.iota {dimensions = array<i32: 1>} : vector<8x16xi32>
    %c4_i32 = arith.constant 4 : i32
    %28 = vector.broadcast %c4_i32 : i32 to vector<8x1xi32>
    %29 = arith.muli %2, %28 : vector<8x1xi32>
    %30 = vector.broadcast %29 : vector<8x1xi32> to vector<8x16xi32>
    %31 = arith.cmpi sge, %27, %30 : vector<8x16xi32>
    %c4_i32_16 = arith.constant 4 : i32
    %32 = vector.broadcast %c4_i32_16 : i32 to vector<8x1xi32>
    %33 = arith.addi %29, %32 : vector<8x1xi32>
    %34 = vector.broadcast %33 : vector<8x1xi32> to vector<8x16xi32>
    %35 = arith.cmpi slt, %27, %34 : vector<8x16xi32>
    %36 = arith.andi %31, %35 : vector<8x16xi1>
    %cst_17 = arith.constant -1.000000e+30 : f32
    %37 = vector.broadcast %cst_17 : f32 to vector<8x16xf32>
    %38 = arith.select %36, %9, %37 : vector<8x16xi1>, vector<8x16xf32>
    %cst_18 = arith.constant dense<0xFF800000> : vector<8xf32>
    %39 = vector.multi_reduction <maximumf>, %38, %cst_18 [1] : vector<8x16xf32> to vector<8xf32>
    %40 = vector.shape_cast %39 : vector<8xf32> to vector<8x1xf32>
    %41 = vector.broadcast %40 : vector<8x1xf32> to vector<8x16xf32>
    %42 = arith.subf %9, %41 : vector<8x16xf32>
    %43 = math.exp %42 : vector<8x16xf32>
    %cst_19 = arith.constant 0.000000e+00 : f32
    %44 = vector.broadcast %cst_19 : f32 to vector<8x16xf32>
    %45 = arith.select %36, %43, %44 : vector<8x16xi1>, vector<8x16xf32>
    %cst_20 = arith.constant dense<0.000000e+00> : vector<8xf32>
    %46 = vector.multi_reduction <add>, %45, %cst_20 [1] : vector<8x16xf32> to vector<8xf32>
    %47 = vector.shape_cast %46 : vector<8xf32> to vector<8x1xf32>
    %48 = math.log %47 : vector<8x1xf32>
    %49 = arith.addf %40, %48 : vector<8x1xf32>
    %c5_i32 = arith.constant 5 : i32
    %50 = vector.broadcast %c5_i32 : i32 to vector<8x1xi32>
    %51 = arith.muli %2, %50 : vector<8x1xi32>
    %52 = vector.broadcast %51 : vector<8x1xi32> to vector<8x16xi32>
    %53 = arith.cmpi eq, %27, %52 : vector<8x16xi32>
    %cst_21 = arith.constant 0.000000e+00 : f32
    %54 = vector.broadcast %cst_21 : f32 to vector<8x16xf32>
    %55 = arith.select %53, %9, %54 : vector<8x16xi1>, vector<8x16xf32>
    %cst_22 = arith.constant dense<0.000000e+00> : vector<8xf32>
    %56 = vector.multi_reduction <add>, %55, %cst_22 [1] : vector<8x16xf32> to vector<8xf32>
    %57 = vector.shape_cast %56 : vector<8xf32> to vector<8x1xf32>
    %58 = arith.subf %49, %57 : vector<8x1xf32>
    %59 = tpu.iota {dimensions = array<i32: 0>} : vector<8x1xi32>
    %c8_i32 = arith.constant 8 : i32
    %60 = arith.muli %arg0, %c8_i32 : i32
    %61 = vector.broadcast %60 : i32 to vector<8x1xi32>
    %62 = arith.addi %59, %61 : vector<8x1xi32>
    %c20_i32 = arith.constant 20 : i32
    %63 = vector.broadcast %c20_i32 : i32 to vector<8x1xi32>
    %64 = arith.cmpi slt, %62, %63 : vector<8x1xi32>
    %65 = arith.extui %64 : vector<8x1xi1> to vector<8x1xi32>
    %66 = arith.sitofp %65 : vector<8x1xi32> to vector<8x1xf32>
    %67 = arith.addf %26, %58 : vector<8x1xf32>
    %68 = arith.mulf %67, %66 : vector<8x1xf32>
    %c0_23 = arith.constant 0 : index
    %c0_24 = arith.constant 0 : index
    %69 = vector.load %arg7[%c0_23, %c0_24] : memref<8x1xf32, #tpu.memory_space<vmem>>, vector<8x1xf32>
    tpu.vector_store %arg7[%c0_23, %c0_24], %68 {strides = array<i32>} : memref<8x1xf32, #tpu.memory_space<vmem>>, vector<8x1xf32>,
    return
  }
  func.func @transform_0(%arg0: i32) -> (i32, i32) {
    %c0_i32 = arith.constant 0 : i32
    %c0_i32_0 = arith.constant 0 : i32
    return %arg0, %c0_i32 : i32, i32
  }
  func.func @transform_1(%arg0: i32) -> (i32, i32) {
    %c0_i32 = arith.constant 0 : i32
    %c0_i32_0 = arith.constant 0 : i32
    return %arg0, %c0_i32 : i32, i32
  }
  func.func @transform_2(%arg0: i32) -> (i32, i32) {
    %c0_i32 = arith.constant 0 : i32
    %c0_i32_0 = arith.constant 0 : i32
    return %arg0, %c0_i32 : i32, i32
  }
  func.func @transform_3(%arg0: i32) -> (i32, i32) {
    %c0_i32 = arith.constant 0 : i32
    %c0_i32_0 = arith.constant 0 : i32
    %c0_i32_1 = arith.constant 0 : i32
    return %c0_i32, %c0_i32_0 : i32, i32
  }
  func.func @transform_4(%arg0: i32) -> (i32, i32) {
    %c0_i32 = arith.constant 0 : i32
    %c0_i32_0 = arith.constant 0 : i32
    %c0_i32_1 = arith.constant 0 : i32
    return %c0_i32, %c0_i32_0 : i32, i32
  }
  func.func @transform_5(%arg0: i32) -> (i32, i32) {
    %c0_i32 = arith.constant 0 : i32
    %c0_i32_0 = arith.constant 0 : i32
    %c0_i32_1 = arith.constant 0 : i32
    return %c0_i32, %c0_i32_0 : i32, i32
  }
  func.func @transform_6(%arg0: i32) -> (i32, i32) {
    %c0_i32 = arith.constant 0 : i32
    %c0_i32_0 = arith.constant 0 : i32
    return %arg0, %c0_i32 : i32, i32
  }
}

</mosaic_0001>

<bundles_post_ra>
// kernel: tpu_custom_call.1
= control target key start
LH: loop header
LB: loop body
LE: loop exit
PB: predicated region body
PF: predicated region fallthrough
CT: control target
= control target key end

     0   :  { %s707_s21 = smov 0   ;;  %s793_s0 = inlined_call_operand.vmem [shape: f32[24,32], index: 0, kind: input, shape index: {}]   ;;  %s794_s1 = inlined_call_operand.vmem [shape: s32[24,1], index: 1, kind: input, shape index: {}]   ;;  %s795_s2 = inlined_call_operand.vmem [shape: s32[24,1], index: 2, kind: input, shape index: {}]   ;;  %s796_s3 = inlined_call_operand.vmem [shape: f32[32,4], index: 3, kind: input, shape index: {}]   ;;  %s797_s4 = inlined_call_operand.vmem [shape: f32[1,4], index: 4, kind: input, shape index: {}]   ;;  %s798_s5 = inlined_call_operand.vmem [shape: f32[32,16], index: 5, kind: input, shape index: {}]   ;;  %s799_s6 = inlined_call_operand.vmem [shape: f32[24,1], index: 6, kind: output, shape index: {}]  }
   0x1 LB: > { %s713_s22 = sadd.s32 4294967295, %s667_s21   ;;  %p596_p0 = scmp.ge.s32.totalorder %s667_s21, 1  ;;  %s667_s21 = sphi %s707_s21, %s16_s21  }
   0x2   : > { %p229_p1 = scmp.lt.s32.totalorder %s667_s21, 4 }
   0x4   : > { %p230_p2 = pnand %p596_p0, %p229_p1 }
   0x5   : > { %p265_p3 = scmp.lt.s32.totalorder (!%p230_p2), %s713_s22, 2  ;;  %s604_s30 = sshll.u32 (!%p230_p2), %s713_s22, 3 }
   0x6   : > { %233 = sbr.rel (%p230_p2) target bundleno = 540 (0x21c), region = 44 }
   0xb   : > { %v287_v0 = vld [vmem:[%s796_s3 + $0x18] sm:$0xff]  ;;  %v669_v2 = vmov 0.0   ;;  %v286_v3 = vld [vmem:[%s796_s3 + $0x10] sm:$0xff]  ;;  %s266_s7 = scalar_select %p265_p3, %s713_s22, 2  ;;  %v285_v5 = vld [vmem:[%s796_s3 + $0x8] sm:$0xff]  ;;  %vm295_vm0 = vcmask 261120   ;;  %v443_v15 = vlaneseq  ;;  %v506_v50 = vstv %s604_s30 }
   0xc   : > { %v372_v1 = vld [vmem:[%s798_s5 + $0x18] sm:$0xff]  ;;  %618 = vmatprep.subr.mxu0 %v669_v2  ;;  %629 = vmatprep.subr.mxu1 %v669_v2  ;;  %v371_v4 = vld [vmem:[%s798_s5 + $0x10] sm:$0xff]  ;;  %v370_v6 = vld [vmem:[%s798_s5 + $0x8] sm:$0xff]  ;;  %vm670_vm1 = vmmov 0   ;;  %v671_v12 = vmov 0   ;;  %vm479_vm4 = vcmask 130048  }
   0xd   : > { %619 = vmatpush3.msra.mxu0 %v287_v0  ;;  %630 = vmatpush3.msra.mxu1 %v372_v1  ;;  %s741_s12 = sshll.u32 %s266_s7, 3  ;;  %v284_v7 = vld [vmem:[%s796_s3] sm:$0xff]  ;;  %v444_v17 = vand.u32 127, %v443_v15  ;;  %vm445_vm6 = vcmask 31744   ;;  %v504_v49 = vshrl.u32 %v443_v15, 7  ;;  %vm513_vm10 = vcmask 7168  }
   0xe   : > { %620 = vmatprep.subr.mxu0 %v669_v2  ;;  %631 = vmatprep.subr.mxu1 %v669_v2  ;;  %s268_s17 = scalar_lea.vmem %s793_s0, %s741_s12  ;;  %s276_s20 = scalar_lea.vmem %s795_s2, %s741_s12  ;;  %v369_v8 = vld [vmem:[%s798_s5] sm:$0xff] }
   0xf   : > { %621 = vmatpush3.msra.mxu0 %v286_v3  ;;  %632 = vmatpush3.msra.mxu1 %v371_v4  ;;  %v283_v9 = vld [vmem:[%s276_s20] sm:$0xff]  ;;  %s272_s27 = scalar_lea.vmem %s794_s1, %s741_s12  ;;  %v507_v54 = vadd.s32 %v506_v50, %v504_v49  ;;  %s280_s8 = scalar_lea.vmem %s799_s6, %s741_s12 }
  0x10   : > { %622 = vmatprep.subr.mxu0 %v669_v2  ;;  %633 = vmatprep.subr.mxu1 %v669_v2  ;;  %v281_v10 = vld [vmem:[%s268_s17] sm:$0xff]  ;;  %v467_v11 = vmul.u32 4, %v283_v9  ;;  %v493_v29 = vmul.u32 5, %v283_v9 }
  0x11   : > { %623 = vmatpush3.msra.mxu0 %v285_v5  ;;  %634 = vmatpush3.msra.mxu1 %v370_v6  ;;  %v282_v14 = vld [vmem:[%s272_s27] sm:$0xff]  ;;  %vm508_vm9 = vcmp.lt.s32.totalorder %v507_v54, 20 }
  0x12   : > { %624 = vmatprep.subr.mxu0 %v669_v2  ;;  %635 = vmatprep.subr.mxu1 %v669_v2  ;;  %v472_v13 = vadd.s32 4, %v467_v11  ;;  %v601_v19 = vld [vmem:[%s797_s4] ss:$0 sm:$0xff]  ;;  %v605_v62 = vsel %vm508_vm9, 1.0, %v669_v2 }
  0x13   : > { %625 = vmatpush3.msra.mxu0 %v284_v7  ;;  %626 = vmatprep.mubr.msk.f32.mxu0 %vm670_vm1, %v669_v2 }
  0x14   : > { %636 = vmatpush3.msra.mxu1 %v369_v8  ;;  %637 = vmatprep.mubr.msk.f32.mxu1 %vm670_vm1, %v669_v2 }
  0x15   : > { %627 = vmatmul.mubr.msk.f32.vlgmr.msra.gmra.mxu0 %vm295_vm0, %v281_v10  ;;  %638 = vmatmul.mubr.msk.f32.vlgmr.msra.gmra.mxu1 %vm295_vm0, %v281_v10 }
  0x16   : > { %651 = vset.pattern.permute.xlu0 %v671_v12  ;;  %652 = vset.pattern.permute.xlu1 %v671_v12 }
  0x17   : > { %469 = vperm.xlu0 %651, %v467_v11  }
  0x1b   : > { %474 = vperm.xlu0 %651, %v472_v13  }
  0x1f   : > { %459 = vperm.xlu0 %651, %v282_v14  }
  0x92   : > { %v470_v16 = vpop.permute.xlu0 %469 }
  0x93   : > { %vm471_vm2 = vcmp.ge.s32.totalorder %v444_v17, %v470_v16 }
  0x96   : > { %v475_v18 = vpop.permute.xlu0 %474 }
  0x97   : > { %vm476_vm3 = vcmp.lt.s32.totalorder %v444_v17, %v475_v18 }
  0x98   : > { %vm770_vm5 = vmand %vm471_vm2, %vm476_vm3 }
  0x9a   : > { %v460_v38 = vpop.permute.xlu0 %459 }
  0x9b   : > { %vm461_vm7 = vcmp.eq.s32.totalorder %v444_v17, %v460_v38 }
  0xd5   : > { %v365_v21 = vpop.f32.mrf.mxu0  ;;  %v439_v22 = vpop.f32.mrf.mxu1 }
  0xd6   : > { %v478_v23 = vsel %vm770_vm5, %v439_v22, -1e+30  ;;  %v366_v24 = vadd.f32 %v601_v19, %v365_v21 }
  0xd7   : > { %v639_v25 = vpop.f32.mrf.mxu1  ;;  %v480_v26 = vsel %vm479_vm4, %v478_v23, -inf  ;;  %v628_v27 = vpop.f32.mrf.mxu0 }
  0xd8   : > { %481 = vmax.xlane.f32.xlu1 %v480_v26  ;;  %v446_v28 = vsel %vm445_vm6, %v366_v24, -inf  ;;  %v462_v43 = vsel %vm461_vm7, %v366_v24, 0.0 }
  0xd9   : > { %v463_v44 = vsel %vm445_vm6, %v462_v43, 0.0 }
  0xdc   : > { %447 = vmax.xlane.f32.xlu1 %v446_v28 }
  0xed   : > { %495 = vperm.xlu1 %652, %v493_v29  }
 0x161   : > { %v482_v30 = vpop.xlane.xlu1 %481 }
 0x162   : > { %v483_v31 = vsub.f32 %v439_v22, %v482_v30 }
 0x164   : > { %v484_v32 = vmul.f32 1.442695, %v483_v31 }
 0x165   : > { %v448_v33 = vpop.xlane.xlu1 %447 }
 0x166   : > { %653 = vpow2.f32 %v484_v32  ;;  %v449_v34 = vsub.f32 %v366_v24, %v448_v33 }
 0x168   : > { %v450_v35 = vmul.f32 1.442695, %v449_v34 }
 0x169   : > { %v496_v41 = vpop.permute.xlu1 %495 }
 0x16a   : > { %655 = vpow2.f32 %v450_v35  ;;  %vm497_vm8 = vcmp.eq.s32.totalorder %v444_v17, %v496_v41 }
 0x16b   : > { %v498_v45 = vsel %vm497_vm8, %v439_v22, 0.0 }
 0x16c   : > { %v499_v46 = vsel %vm479_vm4, %v498_v45, 0.0 }
 0x173   : > { %v654_v36 = vpop.eup %653 }
 0x174   : > { %v486_v37 = vsel %vm770_vm5, %v654_v36, 0.0 }
 0x175   : > { %v487_v39 = vsel %vm479_vm4, %v486_v37, 0.0 }
 0x176   : > { %488 = vadd.xlane.f32.xlu1 %v487_v39 }
 0x177   : > { %v656_v40 = vpop.eup %655 }
 0x178   : > { %v452_v42 = vsel %vm445_vm6, %v656_v40, 0.0 }
 0x179   : > { %453 = vadd.xlane.f32.xlu0 %v452_v42 }
 0x17d   : > { %464 = vadd.xlane.f32.xlu0 %v463_v44 }
 0x181   : > { %500 = vadd.xlane.f32.xlu0 %v499_v46 }
 0x1ff   : > { %v489_v47 = vpop.xlane.xlu1 %488 }
 0x200   : > { %657 = vlog2.f32 %v489_v47 }
 0x202   : > { %v454_v48 = vpop.xlane.xlu0 %453 }
 0x203   : > { %659 = vlog2.f32 %v454_v48 }
 0x206   : > { %v465_v53 = vpop.xlane.xlu0 %464 }
 0x20a   : > { %v501_v59 = vpop.xlane.xlu0 %500 }
 0x20d   : > { %v658_v51 = vpop.eup %657 }
 0x20e   : > { %v491_v52 = vmul.f32 0.6931472, %v658_v51 }
 0x210   : > { %v660_v55 = vpop.eup %659  ;;  %v492_v57 = vadd.f32 %v491_v52, %v482_v30 }
 0x211   : > { %v456_v56 = vmul.f32 0.6931472, %v660_v55 }
 0x212   : > { %v502_v61 = vsub.f32 %v492_v57, %v501_v59 }
 0x213   : > { %v457_v58 = vadd.f32 %v456_v56, %v448_v33 }
 0x215   : > { %v466_v60 = vsub.f32 %v457_v58, %v465_v53 }
 0x217   : > { %v511_v63 = vadd.f32 %v502_v61, %v466_v60 }
 0x219   : > { %v512_v0 = vmul.f32 %v605_v62, %v511_v63 }
 0x21b   : > { %514 = vst.msk [vmem:[%s280_s8] sm:$0xff] %vm513_vm10, %v512_v0 }
 0x21c PF: > { %s16_s21 = sadd.s32 1, %s667_s21  }
 0x21d   : > { %p13_p4 = scmp.ge.s32.totalorder %s16_s21, 5  }
 0x21f   :  { %15 = sbr.rel (!%p13_p4) target bundleno = 1 (0x1), region = 80 }

</bundles_post_ra>
